<compile_context>
chip_gen: v7x
topology: tpu7x:2x2x1
jax: 0.10.0
libtpu: 0.0.40
codegen_flags: <defaults>
</compile_context>

<pallas_src>
import jax
import jax.numpy as jnp
from jax.experimental import pallas as pl
from jax.experimental.pallas import tpu as pltpu


def _round_up(x, m):
    return ((x + m - 1) // m) * m


def _mlp_kernel(x_ref, w1_ref, b1_ref, w2_ref, b2_ref, w3_ref, b3_ref, o_ref):
    """Fused 3-layer MLP forward for one batch tile.

    x_ref : (TM, D)  bf16 activation tile
    w1_ref: (D, H)   bf16    b1_ref: (1, H) f32
    w2_ref: (H, H)   bf16    b2_ref: (1, H) f32
    w3_ref: (1, H)   bf16    (final-layer weight passed as a row)
    b3_ref: (1,)     f32 scalar in SMEM
    o_ref : (1, TM)  f32 lane-dense output row
    """
    x = x_ref[...]

    # Layer 1: bf16 MXU matmul, f32 accumulation; bias + ReLU on the VPU.
    h1 = jnp.dot(x, w1_ref[...], preferred_element_type=jnp.float32) + b1_ref[...]
    h1 = jnp.maximum(h1, 0.0).astype(jnp.bfloat16)

    # Layer 2: same.
    h2 = jnp.dot(h1, w2_ref[...], preferred_element_type=jnp.float32) + b2_ref[...]
    h2 = jnp.maximum(h2, 0.0)

    # Layer 3 (H -> 1) is a degenerate GEMV: VPU multiply + lane (XLU) reduction,
    # instead of a full MXU pass for a single useful result column.
    w3 = w3_ref[...].astype(jnp.float32)                 # (1, H)
    out = jnp.sum(h2 * w3, axis=-1) + b3_ref[0]          # (TM,)

    # Lane-dense store: one (1, TM) row, not a (TM, 1) masked narrow column.
    o_ref[...] = out[None, :].astype(o_ref.dtype)


def mlp_forward(x, params, *, batch_tile=256):
    """Run the fused Pallas MLP.

    Args:
      x: (B, S, F) float32 input (PyTorch-style (batch, seq, features)).
      params: dict with w1 (D_in,H), b1 (1,H), w2 (H,H), b2 (1,H), w3 (H,1), b3 (1,1), all f32.

    Returns:
      (B, 1) float32 predictions.
    """
    B = x.shape[0]
    d_in = x.shape[1] * x.shape[2]
    hidden = params["w1"].shape[1]

    # Pad feature / hidden dims to 128-lane multiples (free: vregs are padded anyway).
    D = _round_up(d_in, 128)
    H = _round_up(hidden, 128)

    # Batch tile: 128-row minimum (lane-dense output rows); up to `batch_tile` rows as B grows.
    TM = min(batch_tile, _round_up(B, 128))
    B_pad = _round_up(B, TM)

    # ---- glue (plain XLA): flatten, zero-pad, cast matmul operands to bf16 ----
    x2d = jnp.pad(x.reshape(B, d_in), ((0, B_pad - B), (0, D - d_in))).astype(jnp.bfloat16)
    w1 = jnp.pad(params["w1"], ((0, D - d_in), (0, H - hidden))).astype(jnp.bfloat16)
    b1 = jnp.pad(params["b1"], ((0, 0), (0, H - hidden))).astype(jnp.float32)
    w2 = jnp.pad(params["w2"], ((0, H - hidden), (0, H - hidden))).astype(jnp.bfloat16)
    b2 = jnp.pad(params["b2"], ((0, 0), (0, H - hidden))).astype(jnp.float32)
    w3 = jnp.pad(params["w3"], ((0, H - hidden), (0, 0))).T.astype(jnp.bfloat16)   # (1, H) row
    b3 = params["b3"].reshape(1).astype(jnp.float32)                               # SMEM scalar

    grid = (B_pad // TM,)

    # VMEM budget: resident weights + double-buffered activation/output tiles + f32
    # intermediates, clamped under v7x's 64 MiB physical VMEM (48 MiB ceiling = headroom).
    est = (2 * (TM * D * 2 + TM * 4)                      # x tile + out row, double-buffered
           + (D * H + H * H + H) * 2 + 2 * H * 4          # bf16 weights + f32 biases (resident)
           + 4 * TM * H * 4)                              # f32 h1/h2 intermediates
    vmem_limit = int(min(48 * 2 ** 20, max(16 * 2 ** 20, 2 * est)))

    out = pl.pallas_call(
        _mlp_kernel,
        out_shape=jax.ShapeDtypeStruct((1, B_pad), jnp.float32),
        grid=grid,
        in_specs=[
            pl.BlockSpec((TM, D), lambda i: (i, 0)),     # streamed activation tile
            pl.BlockSpec((D, H), lambda i: (0, 0)),      # constant index -> weights VMEM-resident
            pl.BlockSpec((1, H), lambda i: (0, 0)),
            pl.BlockSpec((H, H), lambda i: (0, 0)),
            pl.BlockSpec((1, H), lambda i: (0, 0)),
            pl.BlockSpec((1, H), lambda i: (0, 0)),
            pl.BlockSpec(memory_space=pltpu.MemorySpace.SMEM),   # b3 scalar, no VMEM tile/DMA
        ],
        out_specs=pl.BlockSpec((1, TM), lambda i: (0, i)),
        compiler_params=pltpu.CompilerParams(
            dimension_semantics=("parallel",),           # shard batch tiles across v7x's 2 TCs
            vmem_limit_bytes=vmem_limit,
        ),
    )(x2d, w1, b1, w2, b2, w3, b3)

    return out[0, :B].reshape(B, 1)


def init_params(key, d_in, hidden):
    """Deterministic parameter init (stand-in for the abstract build_model())."""
    k1, k2, k3 = jax.random.split(key, 3)
    scale1 = 1.0 / jnp.sqrt(jnp.float32(d_in))
    scale2 = 1.0 / jnp.sqrt(jnp.float32(hidden))
    return {
        "w1": jax.random.normal(k1, (d_in, hidden), jnp.float32) * scale1,
        "b1": jnp.zeros((1, hidden), jnp.float32),
        "w2": jax.random.normal(k2, (hidden, hidden), jnp.float32) * scale2,
        "b2": jnp.zeros((1, hidden), jnp.float32),
        "w3": jax.random.normal(k3, (hidden, 1), jnp.float32) * scale2,
        "b3": jnp.zeros((1, 1), jnp.float32),
    }


if __name__ == "__main__":
    key = jax.random.PRNGKey(0)
    kx, kp = jax.random.split(key)

    B, S, F = 8, 8, 4          # small (batch, seq, features) regression input
    HIDDEN = 32
    D_IN = S * F

    x = jax.random.normal(kx, (B, S, F), jnp.float32)
    params = init_params(kp, D_IN, HIDDEN)

    y = jax.block_until_ready(mlp_forward(x, params))

    # pure-JAX f32 reference check (kernel uses bf16 matmul operands -> relaxed tolerance)
    x2d = x.reshape(B, D_IN)
    h1 = jnp.maximum(x2d @ params["w1"] + params["b1"], 0.0)
    h2 = jnp.maximum(h1 @ params["w2"] + params["b2"], 0.0)
    y_ref = h2 @ params["w3"] + params["b3"]

    assert y.shape == (B, 1)
    assert jnp.allclose(y, y_ref, atol=5e-2, rtol=5e-2), (y, y_ref)

    print("KERNEL_OK")
</pallas_src>

<mosaic_0001>
module attributes {stable_mosaic.version = 11 : i64} {
  func.func @_mlp_kernel(%arg0: i32, %arg1: memref<128x128xbf16, #tpu.memory_space<vmem>>, %arg2: memref<128x128xbf16, #tpu.memory_space<vmem>>, %arg3: memref<1x128xf32, #tpu.memory_space<vmem>>, %arg4: memref<128x128xbf16, #tpu.memory_space<vmem>>, %arg5: memref<1x128xf32, #tpu.memory_space<vmem>>, %arg6: memref<1x128xbf16, #tpu.memory_space<vmem>>, %arg7: memref<1xf32, #tpu.memory_space<smem>>, %arg8: memref<1x128xf32, #tpu.memory_space<vmem>>) attributes {dimension_semantics = [#tpu.dimension_semantics<parallel>], iteration_bounds = array<i64: 1>, scalar_prefetch = 0 : i64, scratch_operands = 0 : i64, tpu.core_type = #tpu.core_type<tc>, window_params = [{transform_indices = @transform_0, window_bounds = array<i64: 128, 128>}, {pipeline_mode = #tpu.pipeline_mode<synchronous>, transform_indices = @transform_1, window_bounds = array<i64: 128, 128>}, {pipeline_mode = #tpu.pipeline_mode<synchronous>, transform_indices = @transform_2, window_bounds = array<i64: 1, 128>}, {pipeline_mode = #tpu.pipeline_mode<synchronous>, transform_indices = @transform_3, window_bounds = array<i64: 128, 128>}, {pipeline_mode = #tpu.pipeline_mode<synchronous>, transform_indices = @transform_4, window_bounds = array<i64: 1, 128>}, {pipeline_mode = #tpu.pipeline_mode<synchronous>, transform_indices = @transform_5, window_bounds = array<i64: 1, 128>}, {transform_indices = @transform_6, window_bounds = array<i64: 1>}, {transform_indices = @transform_7, window_bounds = array<i64: 1, 128>}]} {
    %c0 = arith.constant 0 : index
    %c0_0 = arith.constant 0 : index
    %0 = vector.load %arg1[%c0, %c0_0] : memref<128x128xbf16, #tpu.memory_space<vmem>>, vector<128x128xbf16>
    %c0_1 = arith.constant 0 : index
    %c0_2 = arith.constant 0 : index
    %1 = vector.load %arg2[%c0_1, %c0_2] : memref<128x128xbf16, #tpu.memory_space<vmem>>, vector<128x128xbf16>
    %cst = arith.constant dense<0.000000e+00> : vector<128x128xf32>
    %2 = tpu.matmul %0, %1, %cst {dimension_numbers = #tpu.dot_dimension_numbers<[1], [0], [0], [1], [0, 0, 1, 1], [], []>} : vector<128x128xbf16>, vector<128x128xbf16>, vector<128x128xf32> -> vector<128x128xf32>
    %c0_3 = arith.constant 0 : index
    %c0_4 = arith.constant 0 : index
    %3 = vector.load %arg3[%c0_3, %c0_4] : memref<1x128xf32, #tpu.memory_space<vmem>>, vector<1x128xf32>
    %4 = vector.broadcast %3 : vector<1x128xf32> to vector<128x128xf32>
    %5 = arith.addf %2, %4 : vector<128x128xf32>
    %cst_5 = arith.constant 0.000000e+00 : f32
    %6 = vector.broadcast %cst_5 : f32 to vector<128x128xf32>
    %7 = arith.maximumf %5, %6 : vector<128x128xf32>
    %8 = arith.truncf %7 : vector<128x128xf32> to vector<128x128xbf16>
    %c0_6 = arith.constant 0 : index
    %c0_7 = arith.constant 0 : index
    %9 = vector.load %arg4[%c0_6, %c0_7] : memref<128x128xbf16, #tpu.memory_space<vmem>>, vector<128x128xbf16>
    %cst_8 = arith.constant dense<0.000000e+00> : vector<128x128xf32>
    %10 = tpu.matmul %8, %9, %cst_8 {dimension_numbers = #tpu.dot_dimension_numbers<[1], [0], [0], [1], [0, 0, 1, 1], [], []>} : vector<128x128xbf16>, vector<128x128xbf16>, vector<128x128xf32> -> vector<128x128xf32>
    %c0_9 = arith.constant 0 : index
    %c0_10 = arith.constant 0 : index
    %11 = vector.load %arg5[%c0_9, %c0_10] : memref<1x128xf32, #tpu.memory_space<vmem>>, vector<1x128xf32>
    %12 = vector.broadcast %11 : vector<1x128xf32> to vector<128x128xf32>
    %13 = arith.addf %10, %12 : vector<128x128xf32>
    %cst_11 = arith.constant 0.000000e+00 : f32
    %14 = vector.broadcast %cst_11 : f32 to vector<128x128xf32>
    %15 = arith.maximumf %13, %14 : vector<128x128xf32>
    %c0_12 = arith.constant 0 : index
    %c0_13 = arith.constant 0 : index
    %16 = vector.load %arg6[%c0_12, %c0_13] : memref<1x128xbf16, #tpu.memory_space<vmem>>, vector<1x128xbf16>
    %17 = arith.extf %16 : vector<1x128xbf16> to vector<1x128xf32>
    %18 = vector.broadcast %17 : vector<1x128xf32> to vector<128x128xf32>
    %19 = arith.mulf %15, %18 : vector<128x128xf32>
    %cst_14 = arith.constant dense<0.000000e+00> : vector<128xf32>
    %20 = vector.multi_reduction <add>, %19, %cst_14 [1] : vector<128x128xf32> to vector<128xf32>
    %c0_15 = arith.constant 0 : index
    %21 = memref.load %arg7[%c0_15] : memref<1xf32, #tpu.memory_space<smem>>
    %22 = vector.broadcast %21 : f32 to vector<128xf32>
    %23 = arith.addf %20, %22 : vector<128xf32>
    %24 = vector.shape_cast %23 : vector<128xf32> to vector<1x128xf32>
    %c0_16 = arith.constant 0 : index
    %c0_17 = arith.constant 0 : index
    %25 = vector.load %arg8[%c0_16, %c0_17] : memref<1x128xf32, #tpu.memory_space<vmem>>, vector<1x128xf32>
    tpu.vector_store %arg8[%c0_16, %c0_17], %24 {strides = array<i32>} : memref<1x128xf32, #tpu.memory_space<vmem>>, vector<1x128xf32>,
    return
  }
  func.func @transform_0(%arg0: i32) -> (i32, i32) {
    %c0_i32 = arith.constant 0 : i32
    %c0_i32_0 = arith.constant 0 : i32
    return %arg0, %c0_i32 : i32, i32
  }
  func.func @transform_1(%arg0: i32) -> (i32, i32) {
    %c0_i32 = arith.constant 0 : i32
    %c0_i32_0 = arith.constant 0 : i32
    %c0_i32_1 = arith.constant 0 : i32
    return %c0_i32, %c0_i32_0 : i32, i32
  }
  func.func @transform_2(%arg0: i32) -> (i32, i32) {
    %c0_i32 = arith.constant 0 : i32
    %c0_i32_0 = arith.constant 0 : i32
    %c0_i32_1 = arith.constant 0 : i32
    return %c0_i32, %c0_i32_0 : i32, i32
  }
  func.func @transform_3(%arg0: i32) -> (i32, i32) {
    %c0_i32 = arith.constant 0 : i32
    %c0_i32_0 = arith.constant 0 : i32
    %c0_i32_1 = arith.constant 0 : i32
    return %c0_i32, %c0_i32_0 : i32, i32
  }
  func.func @transform_4(%arg0: i32) -> (i32, i32) {
    %c0_i32 = arith.constant 0 : i32
    %c0_i32_0 = arith.constant 0 : i32
    %c0_i32_1 = arith.constant 0 : i32
    return %c0_i32, %c0_i32_0 : i32, i32
  }
  func.func @transform_5(%arg0: i32) -> (i32, i32) {
    %c0_i32 = arith.constant 0 : i32
    %c0_i32_0 = arith.constant 0 : i32
    %c0_i32_1 = arith.constant 0 : i32
    return %c0_i32, %c0_i32_0 : i32, i32
  }
  func.func @transform_6(%arg0: i32) -> i32 {
    %c0_i32 = arith.constant 0 : i32
    %c0_i32_0 = arith.constant 0 : i32
    return %c0_i32 : i32
  }
  func.func @transform_7(%arg0: i32) -> (i32, i32) {
    %c0_i32 = arith.constant 0 : i32
    %c0_i32_0 = arith.constant 0 : i32
    return %c0_i32, %arg0 : i32, i32
  }
}

</mosaic_0001>

<bundles_post_ra>
// kernel: tpu_custom_call.1
= control target key start
LH: loop header
LB: loop body
LE: loop exit
PB: predicated region body
PF: predicated region fallthrough
CT: control target
= control target key end

     0   :  { %13 = vsyncpa [#allocation4], 0  ;;  %s1192_s0 = inlined_call_operand.hbm [shape: bf16[128,128], index: 0, kind: input, shape index: {}]   ;;  %s1193_s1 = inlined_call_operand.hbm [shape: bf16[128,128], index: 1, kind: input, shape index: {}]   ;;  %s1194_s2 = inlined_call_operand.vmem [shape: f32[1,128], index: 2, kind: input, shape index: {}]   ;;  %s1195_s3 = inlined_call_operand.hbm [shape: bf16[128,128], index: 3, kind: input, shape index: {}]   ;;  %s1196_s4 = inlined_call_operand.vmem [shape: f32[1,128], index: 4, kind: input, shape index: {}]   ;;  %s1197_s5 = inlined_call_operand.vmem [shape: bf16[1,128], index: 5, kind: input, shape index: {}]   ;;  %s1198_s6 = inlined_call_operand.<no memory space> [shape: f32[1], index: 6, kind: input, shape index: {}]   ;;  %s1199_s7 = inlined_call_operand.hbm [shape: f32[1,128], index: 7, kind: output, shape index: {}]  }
   0x1   :  { %14 = vsyncpa [#allocation7], 0 }
   0x2   :  { %15 = vsyncpa [#allocation5], 0  ;;  %s973_s24 = smov [#allocation6]   ;;  %s974_s26 = smov [#allocation3]  }
   0x3   :  { %s33_s25 = sshll.u32 %s973_s24, 4  ;;  %s21_s27 = sshll.u32 %s974_s26, 4  ;;  %s34_s25 = int_to_ptr.vmem [resolvable:$true] %s33_s25  ;;  %s1019_s27 = int_to_ptr.vmem [resolvable:$true] %s21_s27 }
   0x4   :  { %s879_s30 = scalar_lea.hbm %s1193_s1, 1024 }
   0x5   :  { %p880_p0 = scmp.ne.s32.totalorder %s1193_s1, %s879_s30  ;;  %p883_p1 = scmp.lt.u32.totalorder %s879_s30, %s1193_s1 }
   0x7   :  { %p885_p2 = pnand %p883_p1, %p880_p0 }
   0x9   :  { %888 = shalt.err (!%p885_p2)
}
   0xa   :  { %s889_s12 = scalar_lea.vmem %s34_s25, 1024  ;;  %p894_p4 = scmp.lt.s32.totalorder %s34_s25, %s34_s25 }
   0xb   :  { %p890_p3 = scmp.ne.s32.totalorder %s34_s25, %s889_s12  ;;  %p895_p5 = scmp.lt.s32.totalorder %s889_s12, %s889_s12 }
   0xd   :  { %p896_p6 = por %p895_p5, %p894_p4 }
   0xf   :  { %p897_p7 = pnand %p896_p6, %p890_p3 }
  0x11   :  { %900 = shalt.err (!%p897_p7)
}
  0x12   :  { %s975_s13 = smov 64   ;;  %s976_s14 = smov 4  }
  0x13   :  { %39 = dma.hbm_to_vmem [thread:$0]  %s1193_s1, 1024, %s34_s25, [#allocation7], %s975_s13, %s975_s13, %s976_s14  }
  0x14   :  { %s901_s19 = scalar_lea.hbm %s1192_s0, 1024 }
  0x15   :  { %p902_p8 = scmp.ne.s32.totalorder %s1192_s0, %s901_s19  ;;  %p905_p9 = scmp.lt.u32.totalorder %s901_s19, %s1192_s0 }
  0x17   :  { %p907_p10 = pnand %p905_p9, %p902_p8 }
  0x19   :  { %910 = shalt.err (!%p907_p10)
}
  0x1a   :  { %s911_s24 = scalar_lea.vmem %s1019_s27, 1024  ;;  %p916_p12 = scmp.lt.s32.totalorder %s1019_s27, %s1019_s27 }
  0x1b   :  { %p912_p11 = scmp.ne.s32.totalorder %s1019_s27, %s911_s24  ;;  %p917_p13 = scmp.lt.s32.totalorder %s911_s24, %s911_s24 }
  0x1d   :  { %p918_p0 = por %p917_p13, %p916_p12 }
  0x1f   :  { %p919_p1 = pnand %p918_p0, %p912_p11 }
  0x21   :  { %922 = shalt.err (!%p919_p1)
}
  0x22   :  { %27 = dma.hbm_to_vmem [thread:$0]  %s1192_s0, 1024, %s1019_s27, [#allocation4], %s975_s13, %s975_s13, %s976_s14  }
  0x23   :  { %s977_s26 = smov [#allocation8]   ;;  %s923_s8 = scalar_lea.hbm %s1195_s3, 1024 }
  0x24   :  { %s47_s28 = sshll.u32 %s977_s26, 4  ;;  %p924_p2 = scmp.ne.s32.totalorder %s1195_s3, %s923_s8  ;;  %s48_s28 = int_to_ptr.vmem [resolvable:$true] %s47_s28 }
  0x25   :  { %p927_p3 = scmp.lt.u32.totalorder %s923_s8, %s1195_s3 }
  0x27   :  { %p929_p4 = pnand %p927_p3, %p924_p2 }
  0x29   :  { %932 = shalt.err (!%p929_p4)
}
  0x2a   :  { %s933_s15 = scalar_lea.vmem %s48_s28, 1024  ;;  %p938_p6 = scmp.lt.s32.totalorder %s48_s28, %s48_s28 }
  0x2b   :  { %p934_p5 = scmp.ne.s32.totalorder %s48_s28, %s933_s15  ;;  %p939_p7 = scmp.lt.s32.totalorder %s933_s15, %s933_s15 }
  0x2d   :  { %p940_p8 = por %p939_p7, %p938_p6 }
  0x2f   :  { %p941_p9 = pnand %p940_p8, %p934_p5 }
  0x31   :  { %944 = shalt.err (!%p941_p9)
}
  0x32   :  { %53 = dma.hbm_to_vmem [thread:$0]  %s1195_s3, 1024, %s48_s28, [#allocation7], %s975_s13, %s975_s13, %s976_s14  }
  0x33   :  { %967 = dma.done.wait [#allocation4], 1024  }
  0x34   :  { %968 = vsyncadd [#allocation4], 4294966272 }
  0x35   :  { %969 = dma.done.wait [#allocation7], 2048  }
  0x36   :  { %970 = vsyncadd [#allocation7], 4294965248  ;;  %v855_v0 = vld [vmem:[#allocation6] sm:$0xff]   ;;  %v856_v1 = vld [vmem:[#allocation6 + $0x8] sm:$0xff]   ;;  %vm609_vm0 = vcmask 130112   ;;  %vm616_vm1 = vcmask 195712  }
  0x37   :  { %785 = vmatprep.subr.bf16.mxu0 %v855_v0  ;;  %v857_v2 = vld [vmem:[#allocation6 + $0x10] sm:$0xff]   ;;  %v858_v3 = vld [vmem:[#allocation6 + $0x18] sm:$0xff]   ;;  %v863_v4 = vld [vmem:[#allocation3] sm:$0xff]   ;;  %vm623_vm2 = vcmask 261312   ;;  %vm630_vm3 = vcmask 326912   ;;  %vm637_vm4 = vcmask 392512  }
  0x38   :  { %786 = vmatpush3.bf16.msra.mxu0 %v855_v0  ;;  %801 = vmatprep.mubr.bf16.mxu0 %v863_v4  ;;  %v859_v5 = vld [vmem:[#allocation6 + $0x20] sm:$0xff]   ;;  %v860_v6 = vld [vmem:[#allocation6 + $0x28] sm:$0xff]   ;;  %v861_v9 = vld [vmem:[#allocation6 + $0x30] sm:$0xff]   ;;  %vm644_vm5 = vcmask 458112   ;;  %vm651_vm6 = vcmask 523712   ;;  %vm658_vm7 = vcmask 589312  }
  0x39   :  { %787 = vmatprep.subr.bf16.mxu0 %v856_v1  ;;  %v871_v7 = vld [vmem:[#allocation8] sm:$0xff]   ;;  %v872_v8 = vld [vmem:[#allocation8 + $0x8] sm:$0xff]   ;;  %v873_v10 = vld [vmem:[#allocation8 + $0x10] sm:$0xff]   ;;  %vm665_vm8 = vcmask 654912   ;;  %vm672_vm9 = vcmask 720512   ;;  %vm679_vm10 = vcmask 786112  }
  0x3a   :  { %817 = vmatprep.subr.bf16.mxu1 %v871_v7  ;;  %v862_v11 = vld [vmem:[#allocation6 + $0x38] sm:$0xff]   ;;  %v875_v13 = vld [vmem:[#allocation8 + $0x20] sm:$0xff]   ;;  %v864_v14 = vld [vmem:[#allocation3 + $0x8] sm:$0xff]   ;;  %vm686_vm11 = vcmask 851712   ;;  %vm693_vm12 = vcmask 917312   ;;  %vm700_vm13 = vcmask 982912  }
  0x3b   :  { %818 = vmatpush3.bf16.msra.mxu1 %v871_v7  ;;  %v874_v12 = vld [vmem:[#allocation8 + $0x18] sm:$0xff]   ;;  %v865_v15 = vld [vmem:[#allocation3 + $0x10] sm:$0xff]   ;;  %v876_v16 = vld [vmem:[#allocation8 + $0x28] sm:$0xff]   ;;  %vm707_vm14 = vcmask 1048512  }
  0x3c   :  { %788 = vmatpush3.bf16.msra.mxu0 %v856_v1  ;;  %819 = vmatprep.subr.bf16.mxu1 %v872_v8  ;;  %v866_v17 = vld [vmem:[#allocation3 + $0x18] sm:$0xff]   ;;  %v867_v18 = vld [vmem:[#allocation3 + $0x20] sm:$0xff]   ;;  %v868_v19 = vld [vmem:[#allocation3 + $0x28] sm:$0xff]  }
  0x3d   :  { %789 = vmatprep.subr.bf16.mxu0 %v857_v2  ;;  %v869_v20 = vld [vmem:[#allocation3 + $0x30] sm:$0xff]   ;;  %v870_v21 = vld [vmem:[#allocation3 + $0x38] sm:$0xff]   ;;  %v727_v24 = vld [vmem:[%s1194_s2] ss:$0 sm:$0xff] }
  0x3e   :  { %v877_v22 = vld [vmem:[#allocation8 + $0x30] sm:$0xff]   ;;  %v878_v23 = vld [vmem:[#allocation8 + $0x38] sm:$0xff]  }
  0x3f   :  { %820 = vmatpush3.bf16.msra.mxu1 %v872_v8 }
  0x40   :  { %790 = vmatpush3.bf16.msra.mxu0 %v857_v2  ;;  %821 = vmatprep.subr.bf16.mxu1 %v873_v10 }
  0x41   :  { %791 = vmatprep.subr.bf16.mxu0 %v858_v3 }
  0x43   :  { %822 = vmatpush3.bf16.msra.mxu1 %v873_v10 }
  0x44   :  { %792 = vmatpush3.bf16.msra.mxu0 %v858_v3  ;;  %823 = vmatprep.subr.bf16.mxu1 %v874_v12 }
  0x45   :  { %793 = vmatprep.subr.bf16.mxu0 %v859_v5 }
  0x47   :  { %824 = vmatpush3.bf16.msra.mxu1 %v874_v12 }
  0x48   :  { %794 = vmatpush3.bf16.msra.mxu0 %v859_v5  ;;  %825 = vmatprep.subr.bf16.mxu1 %v875_v13 }
  0x49   :  { %795 = vmatprep.subr.bf16.mxu0 %v860_v6 }
  0x4b   :  { %826 = vmatpush3.bf16.msra.mxu1 %v875_v13 }
  0x4c   :  { %796 = vmatpush3.bf16.msra.mxu0 %v860_v6  ;;  %827 = vmatprep.subr.bf16.mxu1 %v876_v16 }
  0x4d   :  { %797 = vmatprep.subr.bf16.mxu0 %v861_v9 }
  0x4f   :  { %828 = vmatpush3.bf16.msra.mxu1 %v876_v16 }
  0x50   :  { %798 = vmatpush3.bf16.msra.mxu0 %v861_v9  ;;  %829 = vmatprep.subr.bf16.mxu1 %v877_v22 }
  0x51   :  { %799 = vmatprep.subr.bf16.mxu0 %v862_v11 }
  0x53   :  { %830 = vmatpush3.bf16.msra.mxu1 %v877_v22  ;;  %v1084_v22 = vld [vmem:[%s1196_s4] ss:$0 sm:$0xff] }
  0x54   :  { %800 = vmatpush3.bf16.msra.mxu0 %v862_v11  ;;  %831 = vmatprep.subr.bf16.mxu1 %v878_v23 }
  0x57   :  { %802 = vmatmul.mubr.bf16.vlgmr.msra.gmra.mrb[0].mxu0 %v864_v14  ;;  %832 = vmatpush3.bf16.msra.mxu1 %v878_v23 }
  0x58   :  { %805 = vmatprep.mubr.bf16.mxu0 %v865_v15 }
  0x5f   :  { %806 = vmatmul.mubr.bf16.gmra.mrb[4].mxu0 %v866_v17  ;;  %v512_v17 = vlaneseq }
  0x60   :  { %809 = vmatprep.mubr.bf16.mxu0 %v867_v18 }
  0x61   :  { %v1075_v18 = vshrl.u32 %v512_v17, 7 }
  0x67   :  { %810 = vmatmul.mubr.bf16.gmra.mrb[8].mxu0 %v868_v19  ;;  %v510_v19 = vld [vmem:[%s1197_s5] sm:$0x1] }
  0x68   :  { %813 = vmatprep.mubr.bf16.mxu0 %v869_v20  ;;  %v511_v20 = vunpack.c.l.bf16 %v510_v19 }
  0x6f   :  { %814 = vmatmul.mubr.bf16.gmra.mrb[12].mxu0 %v870_v21  ;;  %v514_v21 = vsub.s32 0, %v1075_v18 }
 0x12a   :  { %v803_v25 = vpop.f32.mrb[0].mxu0 }
 0x12b   :  { %v248_v26 = vadd.f32 %v803_v25, %v727_v24  ;;  %v239_v27 = vpop.f32.mrb[1].mxu0 }
 0x12c   :  { %v240_v28 = vadd.f32 %v727_v24, %v239_v27  ;;  %v804_v29 = vpop.f32.mrb[2].mxu0 }
 0x12d   :  { %v251_v30 = vadd.f32 %v804_v29, %v727_v24  ;;  %v242_v31 = vpop.f32.mrb[3].mxu0  ;;  %v304_v33 = vmax.f32 %v248_v26, 0.0  ;;  %v1087_v26 = vrot.slane %v511_v20, %v514_v21 }
 0x12e   :  { %v243_v32 = vadd.f32 %v727_v24, %v242_v31  ;;  %v302_v35 = vmax.f32 %v240_v28, 0.0 }
 0x12f   :  { %v305_v34 = vmax.f32 %v251_v30, 0.0 }
 0x130   :  { %v303_v36 = vmax.f32 %v243_v32, 0.0 }
 0x131   :  { %v319_v37 = vpack.c.bf16 %v305_v34, %v304_v33 }
 0x132   :  { %v807_v38 = vpop.f32.mrb[4].mxu0  ;;  %v318_v39 = vpack.c.bf16 %v303_v36, %v302_v35 }
 0x133   :  { %v264_v40 = vadd.f32 %v807_v38, %v727_v24  ;;  %v255_v41 = vpop.f32.mrb[5].mxu0 }
 0x134   :  { %v256_v42 = vadd.f32 %v727_v24, %v255_v41  ;;  %v808_v43 = vpop.f32.mrb[6].mxu0  ;;  %833 = vmatprep.mubr.bf16.mxu1 %v318_v39 }
 0x135   :  { %v267_v44 = vadd.f32 %v808_v43, %v727_v24  ;;  %v258_v45 = vpop.f32.mrb[7].mxu0  ;;  %834 = vmatmul.mubr.bf16.vlgmr.msra.gmra.mrb[0].mxu1 %v319_v37  ;;  %v308_v47 = vmax.f32 %v264_v40, 0.0 }
 0x136   :  { %v259_v46 = vadd.f32 %v727_v24, %v258_v45  ;;  %v306_v49 = vmax.f32 %v256_v42, 0.0 }
 0x137   :  { %v309_v48 = vmax.f32 %v267_v44, 0.0 }
 0x138   :  { %v307_v50 = vmax.f32 %v259_v46, 0.0 }
 0x139   :  { %v321_v51 = vpack.c.bf16 %v309_v48, %v308_v47 }
 0x13a   :  { %v320_v52 = vpack.c.bf16 %v307_v50, %v306_v49  ;;  %v811_v53 = vpop.f32.mrb[8].mxu0 }
 0x13b   :  { %v280_v54 = vadd.f32 %v811_v53, %v727_v24  ;;  %v271_v55 = vpop.f32.mrb[9].mxu0 }
 0x13c   :  { %v272_v56 = vadd.f32 %v727_v24, %v271_v55  ;;  %v812_v57 = vpop.f32.mrb[10].mxu0  ;;  %837 = vmatprep.mubr.bf16.mxu1 %v320_v52 }
 0x13d   :  { %v283_v58 = vadd.f32 %v812_v57, %v727_v24  ;;  %v274_v59 = vpop.f32.mrb[11].mxu0  ;;  %838 = vmatmul.mubr.bf16.gmra.mrb[4].mxu1 %v321_v51  ;;  %v312_v61 = vmax.f32 %v280_v54, 0.0 }
 0x13e   :  { %v275_v60 = vadd.f32 %v727_v24, %v274_v59  ;;  %v310_v63 = vmax.f32 %v272_v56, 0.0 }
 0x13f   :  { %v313_v62 = vmax.f32 %v283_v58, 0.0 }
 0x140   :  { %v311_v0 = vmax.f32 %v275_v60, 0.0 }
 0x141   :  { %v323_v1 = vpack.c.bf16 %v313_v62, %v312_v61 }
 0x142   :  { %v322_v2 = vpack.c.bf16 %v311_v0, %v310_v63  ;;  %v815_v3 = vpop.f32.mrb[12].mxu0 }
 0x143   :  { %v296_v4 = vadd.f32 %v815_v3, %v727_v24  ;;  %v287_v5 = vpop.f32.mrb[13].mxu0 }
 0x144   :  { %v288_v6 = vadd.f32 %v727_v24, %v287_v5  ;;  %v816_v7 = vpop.f32.mrb[14].mxu0  ;;  %841 = vmatprep.mubr.bf16.mxu1 %v322_v2 }
 0x145   :  { %v299_v8 = vadd.f32 %v816_v7, %v727_v24  ;;  %v290_v9 = vpop.f32.mrb[15].mxu0  ;;  %842 = vmatmul.mubr.bf16.gmra.mrb[8].mxu1 %v323_v1  ;;  %v316_v11 = vmax.f32 %v296_v4, 0.0 }
 0x146   :  { %v291_v10 = vadd.f32 %v727_v24, %v290_v9  ;;  %v314_v13 = vmax.f32 %v288_v6, 0.0 }
 0x147   :  { %v317_v12 = vmax.f32 %v299_v8, 0.0 }
 0x148   :  { %v315_v14 = vmax.f32 %v291_v10, 0.0 }
 0x149   :  { %v325_v15 = vpack.c.bf16 %v317_v12, %v316_v11 }
 0x14a   :  { %v324_v16 = vpack.c.bf16 %v315_v14, %v314_v13 }
 0x14c   :  { %845 = vmatprep.mubr.bf16.mxu1 %v324_v16 }
 0x14d   :  { %846 = vmatmul.mubr.bf16.gmra.mrb[12].mxu1 %v325_v15 }
 0x208   :  { %v835_v23 = vpop.f32.mrb[0].mxu1 }
 0x209   :  { %v440_v24 = vadd.f32 %v835_v23, %v1084_v22  ;;  %v431_v25 = vpop.f32.mrb[1].mxu1 }
 0x20a   :  { %v432_v27 = vadd.f32 %v1084_v22, %v431_v25  ;;  %v836_v28 = vpop.f32.mrb[2].mxu1 }
 0x20b   :  { %v496_v29 = vmax.f32 %v440_v24, 0.0  ;;  %v443_v30 = vadd.f32 %v836_v28, %v1084_v22  ;;  %v434_v31 = vpop.f32.mrb[3].mxu1  ;;  %v1121_v28 = vand.u32 127, %v512_v17 }
 0x20c   :  { %v494_v32 = vmax.f32 %v432_v27, 0.0  ;;  %v435_v33 = vadd.f32 %v1084_v22, %v434_v31  ;;  %v1127_v31 = vstv %s1198_s6  ;;  %s978_s6 = smov [#allocation9]  }
 0x20d   :  { %v497_v34 = vmax.f32 %v443_v30, 0.0  ;;  %v518_v35 = vmul.f32 %v1087_v26, %v496_v29  ;;  %v604_v29 = vadd.s32 4294967288, %v1121_v28  ;;  %s717_s18 = sshll.u32 %s978_s6, 4  ;;  %s718_s18 = int_to_ptr.vmem [resolvable:$true] %s717_s18 }
 0x20e   :  { %v495_v36 = vmax.f32 %v435_v33, 0.0  ;;  %v516_v37 = vmul.f32 %v1087_v26, %v494_v32  ;;  %v611_v32 = vadd.s32 4294967280, %v1121_v28  ;;  %s945_s19 = scalar_lea.vmem %s718_s18, 16  ;;  %s949_s20 = scalar_lea.vmem %s718_s18, 32 }
 0x20f   :  { %536 = vadd.xlane.f32.xlu1 %v518_v35  ;;  %v519_v41 = vmul.f32 %v1087_v26, %v497_v34  ;;  %v607_v33 = vsub.s32 %v604_v29, %v1075_v18  ;;  %p946_p10 = scmp.ne.s32.totalorder %s718_s18, %s945_s19  ;;  %p950_p11 = scmp.lt.s32.totalorder %s718_s18, %s718_s18 }
 0x210   :  { %v839_v38 = vpop.f32.mrb[4].mxu1  ;;  %532 = vadd.xlane.f32.xlu0 %v516_v37  ;;  %v517_v44 = vmul.f32 %v1087_v26, %v495_v36  ;;  %v614_v37 = vsub.s32 %v611_v32, %v1075_v18  ;;  %p951_p12 = scmp.lt.s32.totalorder %s949_s20, %s945_s19 }
 0x211   :  { %v456_v39 = vadd.f32 %v839_v38, %v1084_v22  ;;  %v447_v40 = vpop.f32.mrb[5].mxu1  ;;  %v618_v38 = vadd.s32 4294967272, %v1121_v28 }
 0x212   :  { %v448_v42 = vadd.f32 %v1084_v22, %v447_v40  ;;  %v840_v43 = vpop.f32.mrb[6].mxu1  ;;  %p952_p13 = por %p951_p12, %p950_p11 }
 0x213   :  { %v500_v45 = vmax.f32 %v456_v39, 0.0  ;;  %v459_v46 = vadd.f32 %v840_v43, %v1084_v22  ;;  %538 = vadd.xlane.f32.xlu1 %v519_v41  ;;  %v450_v47 = vpop.f32.mrb[7].mxu1  ;;  %v625_v41 = vadd.s32 4294967264, %v1121_v28 }
 0x214   :  { %v451_v48 = vadd.f32 %v1084_v22, %v450_v47  ;;  %534 = vadd.xlane.f32.xlu0 %v517_v44  ;;  %v498_v51 = vmax.f32 %v448_v42, 0.0  ;;  %v632_v44 = vadd.s32 4294967256, %v1121_v28  ;;  %v621_v47 = vsub.s32 %v618_v38, %v1075_v18  ;;  %p953_p0 = pnand %p952_p13, %p946_p10 }
 0x215   :  { %v501_v49 = vmax.f32 %v459_v46, 0.0  ;;  %v522_v50 = vmul.f32 %v1087_v26, %v500_v45  ;;  %v639_v45 = vadd.s32 4294967248, %v1121_v28 }
 0x216   :  { %v499_v52 = vmax.f32 %v451_v48, 0.0  ;;  %v520_v59 = vmul.f32 %v1087_v26, %v498_v51  ;;  %v628_v51 = vsub.s32 %v625_v41, %v1075_v18 }
 0x217   :  { %v523_v53 = vmul.f32 %v1087_v26, %v501_v49 }
 0x218   :  { %v843_v54 = vpop.f32.mrb[8].mxu1  ;;  %544 = vadd.xlane.f32.xlu0 %v522_v50  ;;  %v521_v63 = vmul.f32 %v1087_v26, %v499_v52  ;;  %v646_v52 = vadd.s32 4294967240, %v1121_v28 }
 0x219   :  { %v472_v55 = vadd.f32 %v843_v54, %v1084_v22  ;;  %546 = vadd.xlane.f32.xlu1 %v523_v53  ;;  %v463_v56 = vpop.f32.mrb[9].mxu1  ;;  %v635_v54 = vsub.s32 %v632_v44, %v1075_v18 }
 0x21a   :  { %v464_v57 = vadd.f32 %v1084_v22, %v463_v56  ;;  %v844_v58 = vpop.f32.mrb[10].mxu1  ;;  %v642_v56 = vsub.s32 %v639_v45, %v1075_v18 }
 0x21b   :  { %v504_v60 = vmax.f32 %v472_v55, 0.0  ;;  %v475_v61 = vadd.f32 %v844_v58, %v1084_v22  ;;  %v466_v62 = vpop.f32.mrb[11].mxu1 }
 0x21c   :  { %v467_v0 = vadd.f32 %v1084_v22, %v466_v62  ;;  %540 = vadd.xlane.f32.xlu0 %v520_v59  ;;  %v502_v3 = vmax.f32 %v464_v57, 0.0 }
 0x21d   :  { %v505_v1 = vmax.f32 %v475_v61, 0.0  ;;  %542 = vadd.xlane.f32.xlu1 %v521_v63  ;;  %v526_v2 = vmul.f32 %v1087_v26, %v504_v60  ;;  %v667_v61 = vadd.s32 4294967216, %v1121_v28 }
 0x21e   :  { %v503_v4 = vmax.f32 %v467_v0, 0.0  ;;  %v524_v11 = vmul.f32 %v1087_v26, %v502_v3  ;;  %v653_v0 = vadd.s32 4294967232, %v1121_v28 }
 0x21f   :  { %v527_v5 = vmul.f32 %v1087_v26, %v505_v1 }
 0x220   :  { %v847_v6 = vpop.f32.mrb[12].mxu1  ;;  %552 = vadd.xlane.f32.xlu0 %v526_v2  ;;  %v525_v13 = vmul.f32 %v1087_v26, %v503_v4  ;;  %v674_v4 = vadd.s32 4294967208, %v1121_v28 }
 0x221   :  { %v479_v7 = vpop.f32.mrb[13].mxu1  ;;  %554 = vadd.xlane.f32.xlu1 %v527_v5  ;;  %v488_v8 = vadd.f32 %v847_v6, %v1084_v22  ;;  %v660_v5 = vadd.s32 4294967224, %v1121_v28 }
 0x222   :  { %v480_v9 = vadd.f32 %v1084_v22, %v479_v7  ;;  %v848_v10 = vpop.f32.mrb[14].mxu1 }
 0x223   :  { %v482_v12 = vpop.f32.mrb[15].mxu1  ;;  %v491_v15 = vadd.f32 %v848_v10, %v1084_v22  ;;  %v508_v19 = vmax.f32 %v488_v8, 0.0  ;;  %v649_v8 = vsub.s32 %v646_v52, %v1075_v18 }
 0x224   :  { %v506_v14 = vmax.f32 %v480_v9, 0.0  ;;  %v483_v16 = vadd.f32 %v1084_v22, %v482_v12  ;;  %548 = vadd.xlane.f32.xlu0 %v524_v11  ;;  %v670_v12 = vsub.s32 %v667_v61, %v1075_v18 }
 0x225   :  { %550 = vadd.xlane.f32.xlu1 %v525_v13  ;;  %v509_v23 = vmax.f32 %v491_v15, 0.0  ;;  %v530_v25 = vmul.f32 %v1087_v26, %v508_v19  ;;  %v656_v13 = vsub.s32 %v653_v0, %v1075_v18  ;;  %v677_v15 = vsub.s32 %v674_v4, %v1075_v18 }
 0x226   :  { %v507_v20 = vmax.f32 %v483_v16, 0.0  ;;  %v528_v21 = vmul.f32 %v1087_v26, %v506_v14  ;;  %v681_v14 = vadd.s32 4294967200, %v1121_v28  ;;  %v663_v19 = vsub.s32 %v660_v5, %v1075_v18 }
 0x227   :  { %v531_v27 = vmul.f32 %v1087_v26, %v509_v23 }
 0x228   :  { %556 = vadd.xlane.f32.xlu0 %v528_v21  ;;  %v529_v24 = vmul.f32 %v1087_v26, %v507_v20  ;;  %v602_v26 = vsub.s32 %v1121_v28, %v1075_v18  ;;  %v688_v20 = vadd.s32 4294967192, %v1121_v28  ;;  %v684_v32 = vsub.s32 %v681_v14, %v1075_v18 }
 0x22a   :  { %558 = vadd.xlane.f32.xlu1 %v529_v24 }
 0x22c   :  { %560 = vadd.xlane.f32.xlu0 %v530_v25 }
 0x22e   :  { %562 = vadd.xlane.f32.xlu1 %v531_v27 }
 0x29c   :  { %v537_v22 = vpop.xlane.xlu1 %536 }
 0x29d   :  { %v533_v30 = vpop.xlane.xlu0 %532  ;;  %v568_v39 = vadd.f32 %v1127_v31, %v537_v22 }
 0x29e   :  { %v566_v34 = vadd.f32 %v1127_v31, %v533_v30 }
 0x29f   :  { %v615_v50 = vrot.slane %v568_v39, %v614_v37  ;;  %v702_v39 = vadd.s32 4294967176, %v1121_v28 }
 0x2a0   :  { %v539_v35 = vpop.xlane.xlu1 %538  ;;  %v603_v42 = vrot.slane %v566_v34, %v602_v26 }
 0x2a1   :  { %v535_v17 = vpop.xlane.xlu0 %534  ;;  %v569_v48 = vadd.f32 %v1127_v31, %v539_v35  ;;  %v691_v35 = vsub.s32 %v688_v20, %v1075_v18 }
 0x2a2   :  { %v567_v36 = vadd.f32 %v1127_v31, %v535_v17 }
 0x2a3   :  { %v622_v59 = vrot.slane %v569_v48, %v621_v47 }
 0x2a4   :  { %v608_v40 = vrot.slane %v567_v36, %v607_v33  ;;  %v695_v33 = vadd.s32 4294967184, %v1121_v28  ;;  %v705_v28 = vsub.s32 %v702_v39, %v1075_v18 }
 0x2a5   :  { %v545_v43 = vpop.xlane.xlu0 %544 }
 0x2a6   :  { %v547_v46 = vpop.xlane.xlu1 %546  ;;  %v610_v49 = vsel %vm609_vm0, %v608_v40, %v603_v42  ;;  %v572_v62 = vadd.f32 %v1127_v31, %v545_v43 }
 0x2a7   :  { %v617_v55 = vsel %vm616_vm1, %v615_v50, %v610_v49  ;;  %v573_v9 = vadd.f32 %v1127_v31, %v547_v46  ;;  %v698_v46 = vsub.s32 %v695_v33, %v1075_v18 }
 0x2a8   :  { %v624_v1 = vsel %vm623_vm2, %v622_v59, %v617_v55  ;;  %v643_v11 = vrot.slane %v572_v62, %v642_v56 }
 0x2a9   :  { %v541_v53 = vpop.xlane.xlu0 %540  ;;  %v650_v27 = vrot.slane %v573_v9, %v649_v8 }
 0x2aa   :  { %v570_v57 = vadd.f32 %v1127_v31, %v541_v53  ;;  %v543_v58 = vpop.xlane.xlu1 %542 }
 0x2ab   :  { %v571_v60 = vadd.f32 %v1127_v31, %v543_v58 }
 0x2ac   :  { %v629_v63 = vrot.slane %v570_v57, %v628_v51 }
 0x2ad   :  { %v636_v2 = vrot.slane %v571_v60, %v635_v54  ;;  %v553_v3 = vpop.xlane.xlu0 %552 }
 0x2ae   :  { %v631_v6 = vsel %vm630_vm3, %v629_v63, %v624_v1  ;;  %v555_v7 = vpop.xlane.xlu1 %554  ;;  %v576_v23 = vadd.f32 %v1127_v31, %v553_v3 }
 0x2af   :  { %v638_v10 = vsel %vm637_vm4, %v636_v2, %v631_v6  ;;  %v577_v22 = vadd.f32 %v1127_v31, %v555_v7 }
 0x2b0   :  { %v645_v21 = vsel %vm644_vm5, %v643_v11, %v638_v10  ;;  %v671_v36 = vrot.slane %v576_v23, %v670_v12 }
 0x2b1   :  { %v549_v16 = vpop.xlane.xlu0 %548  ;;  %v652_v26 = vsel %vm651_vm6, %v650_v27, %v645_v21  ;;  %v678_v40 = vrot.slane %v577_v22, %v677_v15 }
 0x2b2   :  { %v574_v24 = vadd.f32 %v1127_v31, %v549_v16  ;;  %v551_v25 = vpop.xlane.xlu1 %550 }
 0x2b3   :  { %v575_v29 = vadd.f32 %v1127_v31, %v551_v25 }
 0x2b4   :  { %v657_v30 = vrot.slane %v574_v24, %v656_v13 }
 0x2b5   :  { %v664_v34 = vrot.slane %v575_v29, %v663_v19  ;;  %v557_v17 = vpop.xlane.xlu0 %556 }
 0x2b6   :  { %v659_v37 = vsel %vm658_vm7, %v657_v30, %v652_v26  ;;  %v578_v38 = vadd.f32 %v1127_v31, %v557_v17 }
 0x2b7   :  { %v666_v41 = vsel %vm665_vm8, %v664_v34, %v659_v37  ;;  %v559_v42 = vpop.xlane.xlu1 %558 }
 0x2b8   :  { %v673_v43 = vsel %vm672_vm9, %v671_v36, %v666_v41  ;;  %v685_v44 = vrot.slane %v578_v38, %v684_v32  ;;  %v579_v45 = vadd.f32 %v1127_v31, %v559_v42 }
 0x2b9   :  { %v680_v47 = vsel %vm679_vm10, %v678_v40, %v673_v43  ;;  %v561_v48 = vpop.xlane.xlu0 %560 }
 0x2ba   :  { %v687_v49 = vsel %vm686_vm11, %v685_v44, %v680_v47  ;;  %v692_v50 = vrot.slane %v579_v45, %v691_v35  ;;  %v580_v51 = vadd.f32 %v1127_v31, %v561_v48 }
 0x2bb   :  { %v563_v52 = vpop.xlane.xlu1 %562 }
 0x2bc   :  { %v694_v53 = vsel %vm693_vm12, %v692_v50, %v687_v49  ;;  %v699_v54 = vrot.slane %v580_v51, %v698_v46  ;;  %v581_v55 = vadd.f32 %v1127_v31, %v563_v52 }
 0x2be   :  { %v706_v56 = vrot.slane %v581_v55, %v705_v28  ;;  %v701_v57 = vsel %vm700_vm13, %v699_v54, %v694_v53 }
 0x2c0   :  { %v708_v58 = vsel %vm707_vm14, %v706_v56, %v701_v57 }
 0x2c1   :  { %710 = vst [vmem:[#allocation9] sm:$0x1] %v708_v58 }
 0x2c2   :  { %956 = shalt.err (!%p953_p0)
}
 0x2c3   :  { %s957_s23 = scalar_lea.hbm %s1199_s7, 16 }
 0x2c4   :  { %p958_p1 = scmp.ne.s32.totalorder %s1199_s7, %s957_s23  ;;  %p961_p2 = scmp.lt.u32.totalorder %s957_s23, %s1199_s7 }
 0x2c6   :  { %p963_p3 = pnand %p961_p2, %p958_p1 }
 0x2c8   :  { %966 = shalt.err (!%p963_p3)
}
 0x2c9   :  { %720 = dma.vmem_to_hbm [thread:$0]  %s718_s18, 16, %s1199_s7, [#allocation5]  }
 0x2ca   :  { %971 = dma.done.wait [#allocation5], 16  }
 0x2cb   :  { %972 = vsyncadd [#allocation5], 4294967280 }
 0x2cc   :  { %724 = vsyncpa [#allocation4], 1 }
 0x2cd   :  { %725 = vsyncpa [#allocation7], 1 }
 0x2ce   :  { %726 = vsyncpa [#allocation5], 1 }

</bundles_post_ra>
